<compile_context>
chip_gen: v6e
topology: v6e:2x2x1
jax: 0.10.0
libtpu: 0.0.40
codegen_flags: <defaults>
</compile_context>

<pallas_src>
import functools

import jax
import jax.numpy as jnp
from jax.experimental import pallas as pl
from jax.experimental.pallas import tpu as pltpu


MATMUL_DTYPE = jnp.bfloat16   # MXU fast path on v5e/v6e/v7x
ACT_DTYPE = jnp.bfloat16      # inter-layer activations (halves HBM traffic)


def _divisor_block(n, cap):
    """Largest divisor of n that is <= cap."""
    t = min(n, cap)
    while n % t:
        t -= 1
    return t


def _row_block(n, cap=512):
    """Row tile for the flattened N = S*B axis: full array if small, otherwise
    a divisor of n whose sublane dim is a multiple of 8."""
    if n <= cap:
        return n
    for t in range(cap, 0, -1):
        if n % t == 0 and t % 8 == 0:
            return t
    return n


# -----------------------------------------------------------------------------
# Kernel 1 (layer 0): token -> gate pre-activation.
# Builds the one-hot in-kernel from int32 tokens, so no (S, B, vocab) f32
# one-hot is ever materialized in HBM.  Bias is folded in here (removes a
# per-timestep VPU add in the recurrence).
# -----------------------------------------------------------------------------
def _embed_proj_kernel(tok_ref, tbl_ref, b_ref, o_ref, *, vocab):
    tok = tok_ref[...]                                       # (TN, 1) int32
    iota = jax.lax.broadcasted_iota(jnp.int32, (tok.shape[0], vocab), 1)
    onehot = (iota == tok).astype(tbl_ref.dtype)             # (TN, V)
    o_ref[...] = (jnp.dot(onehot, tbl_ref[...],
                          preferred_element_type=jnp.float32)
                  + b_ref[...])


def embed_input_proj(tokens_flat, w_ih, bias, vocab):
    """tokens_flat: (N,) int32.  w_ih: (4H, V).  bias: (4H,).
    Returns gates_x: (N, 4H) f32 = one_hot(tokens) @ W_ih^T + bias."""
    N = tokens_flat.shape[0]
    G = w_ih.shape[0]
    tbl = jnp.asarray(w_ih.T, MATMUL_DTYPE)                  # (V, 4H)
    b = jnp.asarray(bias[None, :], jnp.float32)              # (1, 4H)
    tok2d = tokens_flat.reshape(N, 1).astype(jnp.int32)
    tn = _row_block(N)
    kernel = functools.partial(_embed_proj_kernel, vocab=vocab)
    return pl.pallas_call(
        kernel,
        out_shape=jax.ShapeDtypeStruct((N, G), jnp.float32),
        grid_spec=pltpu.PrefetchScalarGridSpec(
            num_scalar_prefetch=0,
            grid=(N // tn,),
            in_specs=[
                pl.BlockSpec((tn, 1), lambda i: (i, 0)),      # tokens
                pl.BlockSpec((vocab, G), lambda i: (0, 0)),   # W_ih^T (+ bias below)
                pl.BlockSpec((1, G), lambda i: (0, 0)),       # bias
            ],
            out_specs=pl.BlockSpec((tn, G), lambda i: (i, 0)),
        ),
        compiler_params=pltpu.CompilerParams(
            dimension_semantics=("parallel",)),
    )(tok2d, tbl, b)


# -----------------------------------------------------------------------------
# Kernel 2 (layers >= 1): dense input projection for the whole sequence.
# One big (N, In) x (In, 4H) bf16 matmul, row-tiled + megacore-parallel.
# -----------------------------------------------------------------------------
def _input_proj_kernel(x_ref, w_ref, b_ref, o_ref):
    o_ref[...] = (jnp.dot(x_ref[...], w_ref[...],
                          preferred_element_type=jnp.float32)
                  + b_ref[...])


def dense_input_proj(x_flat, w_ih, bias):
    """x_flat: (N, In).  w_ih: (4H, In).  bias: (4H,).  Returns (N, 4H) f32."""
    N, In = x_flat.shape
    G = w_ih.shape[0]
    w_t = jnp.asarray(w_ih.T, MATMUL_DTYPE)                  # (In, 4H)
    b = jnp.asarray(bias[None, :], jnp.float32)
    x = x_flat.astype(MATMUL_DTYPE)
    tn = _row_block(N)
    return pl.pallas_call(
        _input_proj_kernel,
        out_shape=jax.ShapeDtypeStruct((N, G), jnp.float32),
        grid_spec=pltpu.PrefetchScalarGridSpec(
            num_scalar_prefetch=0,
            grid=(N // tn,),
            in_specs=[
                pl.BlockSpec((tn, In), lambda i: (i, 0)),
                pl.BlockSpec((In, G), lambda i: (0, 0)),
                pl.BlockSpec((1, G), lambda i: (0, 0)),
            ],
            out_specs=pl.BlockSpec((tn, G), lambda i: (i, 0)),
        ),
        compiler_params=pltpu.CompilerParams(
            dimension_semantics=("parallel",)),
    )(x, w_t, b)


# -----------------------------------------------------------------------------
# Kernel 3: the sequential recurrence.  Only h_prev @ W_hh^T happens per step;
# TS timesteps are processed per grid iteration; h/c carries live in f32 VMEM
# scratch; final states are written once (last grid step).
# Grid = (batch_blocks [parallel], time_blocks [arbitrary]).
# -----------------------------------------------------------------------------
def _lstm_recurrence_kernel(gx_ref, whh_ref, h0_ref, c0_ref,
                            y_ref, hN_ref, cN_ref, h_scr, c_scr,
                            *, hidden, ts):
    t = pl.program_id(1)

    @pl.when(t == 0)
    def _():
        h_scr[...] = h0_ref[...]
        c_scr[...] = c0_ref[...]

    def step(i, carry):
        gx = gx_ref[i]                                        # (BB, 4H) f32
        h_prev = h_scr[...]                                   # (BB, H)  f32
        gates = gx + jnp.dot(h_prev.astype(whh_ref.dtype), whh_ref[...],
                             preferred_element_type=jnp.float32)
        # PyTorch gate order: i, f, g, o.
        # NOTE: for H not a multiple of 128 these slices are not lane-aligned;
        # for large hidden sizes pad H to a lane multiple for free slicing.
        i_g = jax.nn.sigmoid(gates[:, 0 * hidden:1 * hidden])
        f_g = jax.nn.sigmoid(gates[:, 1 * hidden:2 * hidden])
        g_g = jnp.tanh(gates[:, 2 * hidden:3 * hidden])
        o_g = jax.nn.sigmoid(gates[:, 3 * hidden:4 * hidden])
        c_new = f_g * c_scr[...] + i_g * g_g
        h_new = o_g * jnp.tanh(c_new)
        h_scr[...] = h_new
        c_scr[...] = c_new
        y_ref[i] = h_new.astype(y_ref.dtype)
        return carry

    jax.lax.fori_loop(0, ts, step, 0, unroll=True)

    @pl.when(t == pl.num_programs(1) - 1)
    def _():
        hN_ref[...] = h_scr[...]
        cN_ref[...] = c_scr[...]


def lstm_recurrence(gates_x, w_hh, h0, c0):
    """gates_x: (S, B, 4H) f32 (input projection + bias already applied).
    w_hh: (4H, H).  h0, c0: (B, H) f32.
    Returns (y (S,B,H) bf16, h_n (B,H) f32, c_n (B,H) f32)."""
    S, B, G = gates_x.shape
    H = w_hh.shape[1]
    whh_t = jnp.asarray(w_hh.T, MATMUL_DTYPE)                 # (H, 4H)

    ts = _divisor_block(S, 32)                 # timesteps per grid iteration
    bb = B // 2 if (B % 16 == 0) else B        # batch shard (v7x megacore)

    kernel = functools.partial(_lstm_recurrence_kernel, hidden=H, ts=ts)
    y, h_n, c_n = pl.pallas_call(
        kernel,
        out_shape=(
            jax.ShapeDtypeStruct((S, B, H), ACT_DTYPE),
            jax.ShapeDtypeStruct((B, H), jnp.float32),
            jax.ShapeDtypeStruct((B, H), jnp.float32),
        ),
        grid_spec=pltpu.PrefetchScalarGridSpec(
            num_scalar_prefetch=0,
            grid=(B // bb, S // ts),
            in_specs=[
                pl.BlockSpec((ts, bb, G), lambda b, t: (t, b, 0)),  # gates_x
                pl.BlockSpec((H, G), lambda b, t: (0, 0)),          # W_hh^T
                pl.BlockSpec((bb, H), lambda b, t: (b, 0)),         # h0
                pl.BlockSpec((bb, H), lambda b, t: (b, 0)),         # c0
            ],
            out_specs=[
                pl.BlockSpec((ts, bb, H), lambda b, t: (t, b, 0)),  # y
                pl.BlockSpec((bb, H), lambda b, t: (b, 0)),         # h_n
                pl.BlockSpec((bb, H), lambda b, t: (b, 0)),         # c_n
            ],
            scratch_shapes=[
                pltpu.VMEM((bb, H), jnp.float32),   # h carry (f32)
                pltpu.VMEM((bb, H), jnp.float32),   # c carry (f32)
            ],
        ),
        compiler_params=pltpu.CompilerParams(
            dimension_semantics=("parallel", "arbitrary")),
    )(gates_x, whh_t, h0, c0)
    return y, h_n, c_n


# -----------------------------------------------------------------------------
# Kernel 4: fused Linear (rnn_size -> vocab) + LogSoftmax, row-tiled.
# -----------------------------------------------------------------------------
def _fc_logsoftmax_kernel(x_ref, w_ref, b_ref, o_ref):
    logits = (jnp.dot(x_ref[...], w_ref[...],
                      preferred_element_type=jnp.float32)
              + b_ref[...])
    m = jnp.max(logits, axis=-1, keepdims=True)
    z = logits - m
    lse = jnp.log(jnp.sum(jnp.exp(z), axis=-1, keepdims=True))
    o_ref[...] = (z - lse).astype(o_ref.dtype)


def fc_logsoftmax(x_flat, w_fc, b_fc):
    """x_flat: (N, H).  w_fc: (V, H).  b_fc: (V,).  Returns (N, V) f32 log-probs."""
    N, H = x_flat.shape
    V = w_fc.shape[0]
    w_t = jnp.asarray(w_fc.T, MATMUL_DTYPE)                   # (H, V)
    b = jnp.asarray(b_fc[None, :], jnp.float32)
    x = x_flat.astype(MATMUL_DTYPE)
    tn = _row_block(N)
    # TODO(synk): for very large vocab, tile V with an online max/LSE
    # accumulator so the (H, V) weight block fits the 64 MiB v7x VMEM budget.
    return pl.pallas_call(
        _fc_logsoftmax_kernel,
        out_shape=jax.ShapeDtypeStruct((N, V), jnp.float32),
        grid_spec=pltpu.PrefetchScalarGridSpec(
            num_scalar_prefetch=0,
            grid=(N // tn,),
            in_specs=[
                pl.BlockSpec((tn, H), lambda i: (i, 0)),
                pl.BlockSpec((H, V), lambda i: (0, 0)),
                pl.BlockSpec((1, V), lambda i: (0, 0)),
            ],
            out_specs=pl.BlockSpec((tn, V), lambda i: (i, 0)),
        ),
        compiler_params=pltpu.CompilerParams(
            dimension_semantics=("parallel",)),
    )(x, w_t, b)


# -----------------------------------------------------------------------------
# Full module forward.
# -----------------------------------------------------------------------------
def lstm_forward(tokens, hidden, params, input_size):
    """tokens: (S, B) int32 (seq-first, like nn.LSTM default).
    hidden = (h0, c0), each (num_layers, B, H) f32.
    Returns (log_probs (S,B,V) f32, (h_n, c_n) each (L,B,H) f32)."""
    h0_all, c0_all = hidden
    S, B = tokens.shape
    N = S * B

    h_finals, c_finals = [], []
    layer_in = None
    for li, (layer_p, h0, c0) in enumerate(zip(params["lstm"], h0_all, c0_all)):
        bias = layer_p["b_ih"] + layer_p["b_hh"]
        if li == 0:
            gx = embed_input_proj(tokens.reshape(N), layer_p["w_ih"],
                                  bias, input_size)
        else:
            gx = dense_input_proj(layer_in.reshape(N, -1), layer_p["w_ih"], bias)
        gx = gx.reshape(S, B, -1)
        y, h_n, c_n = lstm_recurrence(gx, layer_p["w_hh"], h0, c0)
        h_finals.append(h_n)
        c_finals.append(c_n)
        layer_in = y     # inter-layer dropout: identity (eval mode)

    H = layer_in.shape[-1]
    out = layer_in       # output dropout: identity (eval mode)
    log_probs = fc_logsoftmax(out.reshape(N, H), params["fc_w"], params["fc_b"])
    log_probs = log_probs.reshape(S, B, -1)
    return log_probs, (jnp.stack(h_finals), jnp.stack(c_finals))


def init_params(key, input_size, rnn_size, num_layers):
    k = 1.0 / jnp.sqrt(jnp.float32(rnn_size))
    params = {"lstm": []}
    for layer in range(num_layers):
        in_sz = input_size if layer == 0 else rnn_size
        key, k1, k2, k3, k4 = jax.random.split(key, 5)
        params["lstm"].append({
            "w_ih": jax.random.uniform(k1, (4 * rnn_size, in_sz),
                                       jnp.float32, -k, k),
            "w_hh": jax.random.uniform(k2, (4 * rnn_size, rnn_size),
                                       jnp.float32, -k, k),
            "b_ih": jax.random.uniform(k3, (4 * rnn_size,),
                                       jnp.float32, -k, k),
            "b_hh": jax.random.uniform(k4, (4 * rnn_size,),
                                       jnp.float32, -k, k),
        })
    key, k5, k6 = jax.random.split(key, 3)
    kf = 1.0 / jnp.sqrt(jnp.float32(rnn_size))
    params["fc_w"] = jax.random.uniform(k5, (input_size, rnn_size),
                                        jnp.float32, -kf, kf)
    params["fc_b"] = jax.random.uniform(k6, (input_size,),
                                        jnp.float32, -kf, kf)
    return params


if __name__ == "__main__":
    input_size = 16     # vocab
    rnn_size = 32
    num_layers = 2
    seq_len = 8
    batch = 2

    key = jax.random.PRNGKey(0)
    key, pkey, tkey = jax.random.split(key, 3)

    params = init_params(pkey, input_size, rnn_size, num_layers)
    tokens = jax.random.randint(tkey, (seq_len, batch), 0, input_size,
                                dtype=jnp.int32)
    h0 = jnp.zeros((num_layers, batch, rnn_size), jnp.float32)
    c0 = jnp.zeros((num_layers, batch, rnn_size), jnp.float32)

    log_probs, (h_n, c_n) = lstm_forward(tokens, (h0, c0), params, input_size)
    jax.block_until_ready((log_probs, h_n, c_n))

    assert log_probs.shape == (seq_len, batch, input_size)
    assert h_n.shape == (num_layers, batch, rnn_size)
    assert c_n.shape == (num_layers, batch, rnn_size)
    # log-softmax sanity: rows sum to ~1 in prob space
    assert jnp.allclose(jnp.exp(log_probs).sum(-1), 1.0, atol=1e-4)

    print("KERNEL_OK")
</pallas_src>

<mosaic_0001>
module attributes {stable_mosaic.version = 11 : i64} {
  func.func @_embed_proj_kernel(%arg0: i32, %arg1: memref<16x1xi32, #tpu.memory_space<vmem>>, %arg2: memref<16x128xbf16, #tpu.memory_space<vmem>>, %arg3: memref<1x128xf32, #tpu.memory_space<vmem>>, %arg4: memref<16x128xf32, #tpu.memory_space<vmem>>) attributes {dimension_semantics = [#tpu.dimension_semantics<parallel>], iteration_bounds = array<i64: 1>, scalar_prefetch = 0 : i64, scratch_operands = 0 : i64, tpu.core_type = #tpu.core_type<tc>, window_params = [{transform_indices = @transform_0, window_bounds = array<i64: 16, 1>}, {pipeline_mode = #tpu.pipeline_mode<synchronous>, transform_indices = @transform_1, window_bounds = array<i64: 16, 128>}, {pipeline_mode = #tpu.pipeline_mode<synchronous>, transform_indices = @transform_2, window_bounds = array<i64: 1, 128>}, {transform_indices = @transform_3, window_bounds = array<i64: 16, 128>}]} {
    %c0 = arith.constant 0 : index
    %c0_0 = arith.constant 0 : index
    %0 = vector.load %arg1[%c0, %c0_0] : memref<16x1xi32, #tpu.memory_space<vmem>>, vector<16x1xi32>
    %1 = tpu.iota {dimensions = array<i32: 1>} : vector<16x16xi32>
    %2 = vector.broadcast %0 : vector<16x1xi32> to vector<16x16xi32>
    %3 = arith.cmpi eq, %1, %2 : vector<16x16xi32>
    %4 = arith.extui %3 : vector<16x16xi1> to vector<16x16xi32>
    %5 = arith.sitofp %4 : vector<16x16xi32> to vector<16x16xf32>
    %6 = arith.truncf %5 : vector<16x16xf32> to vector<16x16xbf16>
    %c0_1 = arith.constant 0 : index
    %c0_2 = arith.constant 0 : index
    %7 = vector.load %arg2[%c0_1, %c0_2] : memref<16x128xbf16, #tpu.memory_space<vmem>>, vector<16x128xbf16>
    %cst = arith.constant dense<0.000000e+00> : vector<16x128xf32>
    %8 = tpu.matmul %6, %7, %cst {dimension_numbers = #tpu.dot_dimension_numbers<[1], [0], [0], [1], [0, 0, 1, 1], [], []>} : vector<16x16xbf16>, vector<16x128xbf16>, vector<16x128xf32> -> vector<16x128xf32>
    %c0_3 = arith.constant 0 : index
    %c0_4 = arith.constant 0 : index
    %9 = vector.load %arg3[%c0_3, %c0_4] : memref<1x128xf32, #tpu.memory_space<vmem>>, vector<1x128xf32>
    %10 = vector.broadcast %9 : vector<1x128xf32> to vector<16x128xf32>
    %11 = arith.addf %8, %10 : vector<16x128xf32>
    %c0_5 = arith.constant 0 : index
    %c0_6 = arith.constant 0 : index
    %12 = vector.load %arg4[%c0_5, %c0_6] : memref<16x128xf32, #tpu.memory_space<vmem>>, vector<16x128xf32>
    tpu.vector_store %arg4[%c0_5, %c0_6], %11 {strides = array<i32>} : memref<16x128xf32, #tpu.memory_space<vmem>>, vector<16x128xf32>,
    return
  }
  func.func @transform_0(%arg0: i32) -> (i32, i32) {
    %c0_i32 = arith.constant 0 : i32
    %c0_i32_0 = arith.constant 0 : i32
    return %arg0, %c0_i32 : i32, i32
  }
  func.func @transform_1(%arg0: i32) -> (i32, i32) {
    %c0_i32 = arith.constant 0 : i32
    %c0_i32_0 = arith.constant 0 : i32
    %c0_i32_1 = arith.constant 0 : i32
    return %c0_i32, %c0_i32_0 : i32, i32
  }
  func.func @transform_2(%arg0: i32) -> (i32, i32) {
    %c0_i32 = arith.constant 0 : i32
    %c0_i32_0 = arith.constant 0 : i32
    %c0_i32_1 = arith.constant 0 : i32
    return %c0_i32, %c0_i32_0 : i32, i32
  }
  func.func @transform_3(%arg0: i32) -> (i32, i32) {
    %c0_i32 = arith.constant 0 : i32
    %c0_i32_0 = arith.constant 0 : i32
    return %arg0, %c0_i32 : i32, i32
  }
}

</mosaic_0001>

<bundles_post_ra>
// kernel: tpu_custom_call.1
= control target key start
LH: loop header
LB: loop body
LE: loop exit
PB: predicated region body
PF: predicated region fallthrough
CT: control target
= control target key end

     0   :  { %v154_v1 = vmov 0   ;;  %v155_v2 = vmov 0.0   ;;  %s195_s0 = inlined_call_operand.vmem [shape: s32[16,1], index: 0, kind: input, shape index: {}]   ;;  %s196_s1 = inlined_call_operand.vmem [shape: bf16[16,128], index: 1, kind: input, shape index: {}]   ;;  %s197_s2 = inlined_call_operand.vmem [shape: f32[1,128], index: 2, kind: input, shape index: {}]   ;;  %s198_s3 = inlined_call_operand.hbm [shape: f32[16,128], index: 3, kind: output, shape index: {}]  }
   0x1   :  { %v16_v0 = vld [vmem:[%s195_s0] sm:$0xff]  ;;  %130 = vset.pattern.permute.xlu0 %v154_v1  ;;  %118 = vmatprep.subr.bf16.mxu0 %v155_v2 }
   0x2   :  { %v131_v3 = vld [vmem:[%s196_s1] sm:$0xff]  }
   0x3   :  { %8 = vsyncpa [#allocation3], 0  ;;  %21 = vperm.xlu0 %130, %v16_v0   ;;  %v17_v4 = vld [vmem:[%s195_s0 + $0x8] sm:$0xff]  ;;  %119 = vmatpush3.bf16.msra.mxu0 %v131_v3  ;;  %vm156_vm0 = vmmov 0   ;;  %v18_v5 = vlaneseq  ;;  %vm48_vm3 = vcmask 130048   ;;  %s157_s0 = smov [#allocation2]  }
   0x4   :  { %120 = vmatprep.mubr.msk.bf16.mxu0 %vm156_vm0, %v155_v2  ;;  %v113_v12 = vld [vmem:[%s197_s2] ss:$0 sm:$0xff]  ;;  %s100_s19 = sshll.u32 %s157_s0, 4  ;;  %s101_s19 = int_to_ptr.vmem [resolvable:$true] %s100_s19 }
   0x5   :  { %v19_v6 = vand.u32 127, %v18_v5  ;;  %s132_s20 = scalar_lea.vmem %s101_s19, 256  ;;  %p137_p1 = scmp.lt.s32.totalorder %s101_s19, %s101_s19 }
   0x6   :  { %p133_p0 = scmp.ne.s32.totalorder %s101_s19, %s132_s20  ;;  %p138_p2 = scmp.lt.s32.totalorder %s132_s20, %s132_s20 }
   0x7   :  { %24 = vperm.xlu0 %130, %v17_v4  }
   0x8   :  { %p139_p3 = por %p138_p2, %p137_p1 }
   0xa   :  { %p140_p4 = pnand %p139_p3, %p133_p0 }
  0x7e   :  { %v22_v7 = vpop.permute.xlu0 %21 }
  0x7f   :  { %vm26_vm1 = vcmp.eq.s32.totalorder %v19_v6, %v22_v7 }
  0x80   :  { %v111_v9 = vsel %vm26_vm1, 1.0, %v155_v2 }
  0x82   :  { %v25_v8 = vpop.permute.xlu0 %24 }
  0x83   :  { %vm27_vm2 = vcmp.eq.s32.totalorder %v19_v6, %v25_v8 }
  0x84   :  { %v112_v10 = vsel %vm27_vm2, 1.0, %v155_v2 }
  0x85   :  { %v32_v11 = vpack.c.bf16 %v112_v10, %v111_v9 }
  0x87   :  { %121 = vmatmul.mubr.msk.bf16.vlgmr.msra.gmra.mxu0 %vm48_vm3, %v32_v11 }
 0x147   :  { %v86_v13 = vpop.f32.mrf.mxu0 }
 0x148   :  { %v87_v14 = vadd.f32 %v113_v12, %v86_v13 }
 0x149   :  { %v122_v15 = vpop.f32.mrf.mxu0 }
 0x14a   :  { %93 = vst [vmem:[#allocation2] sm:$0xff] %v87_v14 }
 0x14b   :  { %v89_v16 = vpop.f32.mrf.mxu0 }
 0x14c   :  { %v90_v17 = vadd.f32 %v113_v12, %v89_v16 }
 0x14d   :  { %v123_v18 = vpop.f32.mrf.mxu0 }
 0x14e   :  { %94 = vst [vmem:[#allocation2 + $0x8] sm:$0xff] %v90_v17 }
 0x14f   :  { %143 = shalt.err (!%p140_p4)
}
 0x150   :  { %s158_s21 = smov 128   ;;  %s159_s2 = smov 8  }
 0x151   :  { %106 = dma.vmem_to_hbm [thread:$0]  %s101_s19, 256, %s198_s3, [#allocation3], %s158_s21, %s158_s21, %s159_s2  }
 0x152   :  { %152 = dma.done.wait [#allocation3], 256  }
 0x153   :  { %153 = vsyncadd [#allocation3], 4294967040 }
 0x154   :  { %110 = vsyncpa [#allocation3], 1 }

</bundles_post_ra>
